<compile_context>
chip_gen: v7x
topology: tpu7x:2x2x1
jax: 0.10.0
libtpu: 0.0.40
codegen_flags: <defaults>
</compile_context>

<pallas_src>
import functools

import numpy as np
import jax
import jax.numpy as jnp
from jax.experimental import pallas as pl
from jax.experimental.pallas import tpu as pltpu


# ----------------------------------------------------------------------------
# Device-dependent compiler params
# ----------------------------------------------------------------------------
@functools.lru_cache(maxsize=None)
def _device_kind():
    try:
        return jax.devices()[0].device_kind.lower()
    except Exception:
        return ""


def _compiler_params(dims):
    kind = _device_kind()
    if "v7" in kind:
        vmem = 48 * 1024 * 1024          # headroom under 64 MiB physical
    elif any(g in kind for g in ("v4", "v5", "v6")):
        vmem = 96 * 1024 * 1024
    else:
        vmem = None
    kwargs = dict(dimension_semantics=dims)
    if vmem is not None:
        kwargs["vmem_limit_bytes"] = vmem
    return pltpu.CompilerParams(**kwargs)


def _row_tile(rows, cap=2048):
    """Largest divisor of `rows` that is <= cap and a multiple of 8."""
    if rows <= cap:
        return rows
    t = cap - (cap % 8)
    while t >= 8:
        if rows % t == 0:
            return t
        t -= 8
    return rows


# ----------------------------------------------------------------------------
# Runtime probe: direction convention of pltpu.roll (robustness guard)
# ----------------------------------------------------------------------------
def _roll_probe_kernel(x_ref, o_ref):
    o_ref[...] = pltpu.roll(x_ref[...], shift=1, axis=0)


def probe_roll_sign():
    """Return +1 if pltpu.roll follows numpy roll semantics, else -1."""
    x = jnp.tile(jnp.arange(8, dtype=jnp.float32)[:, None], (1, 128))
    y = pl.pallas_call(
        _roll_probe_kernel,
        out_shape=jax.ShapeDtypeStruct((8, 128), jnp.float32),
    )(x)
    return 1 if float(y[1, 0]) == 0.0 else -1


def _roll_rows(x, k, sign):
    """y[r] = x[(r - k) % R]  (numpy np.roll(x, k) semantics along axis 0)."""
    R = x.shape[0]
    kk = k % R
    if kk == 0:
        return x
    shift = kk if sign == 1 else (R - kk) % R
    return pltpu.roll(x, shift=shift, axis=0)


# ----------------------------------------------------------------------------
# 1x1 conv + ReLU (only used for layer4_1x1, which feeds the first upsample)
# ----------------------------------------------------------------------------
def _conv1x1_kernel(x_ref, w_ref, b_ref, o_ref):
    acc = jnp.dot(x_ref[...], w_ref[...], preferred_element_type=jnp.float32)
    o_ref[...] = jnp.maximum(acc + b_ref[...], 0.0).astype(o_ref.dtype)


def conv1x1(x, w, b):
    """ReLU(x @ w + b).  x: (N,H,W,Cin) NHWC; w: (Cin,Cout); b: (Cout,)."""
    N, H, W, Cin = x.shape
    Cout = w.shape[1]
    rows = N * H * W
    tm = _row_tile(rows)
    out = pl.pallas_call(
        _conv1x1_kernel,
        out_shape=jax.ShapeDtypeStruct((rows, Cout), jnp.bfloat16),
        grid_spec=pltpu.PrefetchScalarGridSpec(
            num_scalar_prefetch=0,
            grid=(rows // tm,),
            in_specs=[
                pl.BlockSpec((tm, Cin), lambda i: (i, 0)),
                pl.BlockSpec((Cin, Cout), lambda i: (0, 0)),
                pl.BlockSpec((1, Cout), lambda i: (0, 0)),
            ],
            out_specs=pl.BlockSpec((tm, Cout), lambda i: (i, 0)),
        ),
        compiler_params=_compiler_params(("parallel",)),
    )(x.reshape(rows, Cin).astype(jnp.bfloat16),
      w.astype(jnp.bfloat16),
      b.reshape(1, Cout).astype(jnp.float32))
    return out.reshape(N, H, W, Cout)


# ----------------------------------------------------------------------------
# Bilinear 2x upsample (align_corners=True), one pallas_call per stage
# ----------------------------------------------------------------------------
def _bilinear_matrix(n_in):
    """Row-interp matrix M (2*n_in, n_in): out = M @ in, align_corners=True."""
    n_out = 2 * n_in
    M = np.zeros((n_out, n_in), np.float32)
    if n_in == 1:
        M[:, 0] = 1.0
        return M
    scale = (n_in - 1) / (n_out - 1)
    for i in range(n_out):
        src = i * scale
        i0 = min(int(np.floor(src)), n_in - 1)
        frac = src - i0
        i1 = min(i0 + 1, n_in - 1)
        M[i, i0] += 1.0 - frac
        M[i, i1] += frac
    return M


def _wtaps(n_in):
    """Per-output-column (w0, f0, w1, f1) taps of the bilinear matrix."""
    M = _bilinear_matrix(n_in)
    taps = []
    for q in range(2 * n_in):
        nz = np.nonzero(M[q])[0]
        w0 = int(nz[0]); f0 = float(M[q, w0])
        if len(nz) > 1:
            w1 = int(nz[1]); f1 = float(M[q, w1])
        else:
            w1, f1 = w0, 0.0
        taps.append((w0, f0, w1, f1))
    return tuple(taps)


def _upsample_kernel(x_ref, mh_ref, o_ref, *, C, wtaps):
    # x_ref: (1, H, W*C) bf16; mh_ref: (2H, H) bf16; o_ref: (1, 2H, 2W*C)
    x2 = x_ref[0]
    yh = jnp.dot(mh_ref[...], x2, preferred_element_type=jnp.float32)  # (2H, W*C)
    pieces = []
    for (w0, f0, w1, f1) in wtaps:                 # W-pass: 2-tap lane combos
        seg = yh[:, w0 * C:(w0 + 1) * C] * f0
        if f1 != 0.0:
            seg = seg + yh[:, w1 * C:(w1 + 1) * C] * f1
        pieces.append(seg.astype(jnp.bfloat16))
    o_ref[0] = jnp.concatenate(pieces, axis=1)     # (2H, 2W*C), q-major lanes


def upsample2x(x):
    """Bilinear x2 (align_corners=True).  x: (N,H,W,C) bf16 -> (N,2H,2W,C)."""
    N, H, W, C = x.shape
    taps = _wtaps(W)
    mh = jnp.asarray(_bilinear_matrix(H), jnp.bfloat16)
    out = pl.pallas_call(
        functools.partial(_upsample_kernel, C=C, wtaps=taps),
        out_shape=jax.ShapeDtypeStruct((N, 2 * H, 2 * W * C), jnp.bfloat16),
        grid_spec=pltpu.PrefetchScalarGridSpec(
            num_scalar_prefetch=0,
            grid=(N,),
            in_specs=[
                pl.BlockSpec((1, H, W * C), lambda n: (n, 0, 0)),
                pl.BlockSpec((2 * H, H), lambda n: (0, 0)),
            ],
            out_specs=pl.BlockSpec((1, 2 * H, 2 * W * C), lambda n: (n, 0, 0)),
        ),
        compiler_params=_compiler_params(("parallel",)),
    )(x.reshape(N, H, W * C).astype(jnp.bfloat16), mh)
    return out.reshape(N, 2 * H, 2 * W, C)         # free metadata reshape


# ----------------------------------------------------------------------------
# Fused decoder stage: [skip 1x1 + ReLU] -> concat -> 3x3 conv + ReLU
# (-> optional fused conv_last).  One pallas_call, one image per grid step.
# ----------------------------------------------------------------------------
def _stage_kernel(*refs, H2, W2, has_proj, has_last, roll_sign):
    a_ref, s_ref = refs[0], refs[1]
    i = 2
    if has_proj:
        w1_ref, b1_ref = refs[i], refs[i + 1]
        i += 2
    w3_ref, b3_ref = refs[i], refs[i + 1]
    i += 2
    if has_last:
        wl_ref, bl_ref = refs[i], refs[i + 1]
        i += 2
    o_ref = refs[i]

    tr = H2 * W2
    a = a_ref[0]                                    # (tr, Ca) bf16 (upsampled)

    # Skip branch: 1x1 conv + ReLU in-kernel (or raw skip for the final stage)
    if has_proj:
        bp = jnp.dot(s_ref[0], w1_ref[...], preferred_element_type=jnp.float32)
        bp = jnp.maximum(bp + b1_ref[...], 0.0).astype(jnp.bfloat16)
    else:
        bp = s_ref[0]

    cat = jnp.concatenate([a, bp], axis=1)          # (tr, Cin) fused concat
    Cin = cat.shape[1]
    Cout = b3_ref.shape[-1]

    # Column index within the image (block always starts at an image boundary;
    # NOTE: must add program_id offsets if strip tiling is ever introduced).
    w_idx = jax.lax.broadcasted_iota(jnp.int32, (tr, 1), 0) % W2
    zero = jnp.zeros((), cat.dtype)
    v0 = jnp.where(w_idx > 0, _roll_rows(cat, 1, roll_sign), zero)        # w-1
    v2 = jnp.where(w_idx < W2 - 1, _roll_rows(cat, -1, roll_sign), zero)  # w+1

    # [left | center | right] lane concat + zero row halo (handles h borders).
    trip = jnp.concatenate([v0, cat, v2], axis=1)   # (tr, 3*Cin)
    zp = jnp.zeros((W2, 3 * Cin), trip.dtype)
    trip_p = jnp.concatenate([zp, trip, zp], axis=0)

    # 3x3 conv as three wide-K matmuls (one per kernel row), f32 accumulation.
    acc = jnp.zeros((tr, Cout), jnp.float32)
    for ky in range(3):
        st = ky * W2
        acc = acc + jnp.dot(trip_p[st:st + tr, :], w3_ref[ky],
                            preferred_element_type=jnp.float32)
    y = jnp.maximum(acc + b3_ref[...], 0.0)

    if has_last:                                    # fused conv_last (no ReLU)
        out = jnp.dot(y.astype(jnp.bfloat16), wl_ref[...],
                      preferred_element_type=jnp.float32) + bl_ref[...]
        o_ref[0] = out.astype(o_ref.dtype)
    else:
        o_ref[0] = y.astype(o_ref.dtype)


def conv3x3_stage(a_up, skip, w1, b1, w3, b3, wl=None, bl=None, *, roll_sign=1):
    """ReLU(conv3x3(concat([a_up, proj(skip)]))) (+ optional final 1x1).

    a_up: (N,H2,W2,Ca) bf16 (already upsampled); skip: (N,H2,W2,Cs) bf16.
    w1/b1: optional 1x1 projection applied to skip in-kernel (with ReLU).
    w3: (3,3,Ca+Cb,Cout) HWIO; wl/bl: optional fused final 1x1 (no ReLU).
    """
    N, H2, W2, Ca = a_up.shape
    Cs = skip.shape[-1]
    has_proj = w1 is not None
    has_last = wl is not None
    Cb = w1.shape[1] if has_proj else Cs
    Cin = Ca + Cb
    Cout = w3.shape[-1]
    assert w3.shape[2] == Cin
    tr = H2 * W2

    a2 = a_up.reshape(N, tr, Ca).astype(jnp.bfloat16)
    s2 = skip.reshape(N, tr, Cs).astype(jnp.bfloat16)
    # Weight rows ordered (kx, cin) per ky -- matches the [v0|cat|v2] lanes.
    w3r = jnp.asarray(w3, jnp.bfloat16).reshape(3, 3 * Cin, Cout)
    b3r = jnp.asarray(b3, jnp.float32).reshape(1, Cout)

    operands = [a2, s2]
    in_specs = [pl.BlockSpec((1, tr, Ca), lambda n: (n, 0, 0)),
                pl.BlockSpec((1, tr, Cs), lambda n: (n, 0, 0))]
    if has_proj:
        operands += [jnp.asarray(w1, jnp.bfloat16),
                     jnp.asarray(b1, jnp.float32).reshape(1, Cb)]
        in_specs += [pl.BlockSpec((Cs, Cb), lambda n: (0, 0)),
                     pl.BlockSpec((1, Cb), lambda n: (0, 0))]
    operands += [w3r, b3r]
    in_specs += [pl.BlockSpec((3, 3 * Cin, Cout), lambda n: (0, 0, 0)),
                 pl.BlockSpec((1, Cout), lambda n: (0, 0))]
    if has_last:
        ncls = wl.shape[1]
        operands += [jnp.asarray(wl, jnp.bfloat16),
                     jnp.asarray(bl, jnp.float32).reshape(1, ncls)]
        in_specs += [pl.BlockSpec((Cout, ncls), lambda n: (0, 0)),
                     pl.BlockSpec((1, ncls), lambda n: (0, 0))]
        out_c, out_dtype = ncls, jnp.float32
    else:
        out_c, out_dtype = Cout, jnp.bfloat16

    out = pl.pallas_call(
        functools.partial(_stage_kernel, H2=H2, W2=W2, has_proj=has_proj,
                          has_last=has_last, roll_sign=roll_sign),
        out_shape=jax.ShapeDtypeStruct((N, tr, out_c), out_dtype),
        grid_spec=pltpu.PrefetchScalarGridSpec(
            num_scalar_prefetch=0,
            grid=(N,),
            in_specs=in_specs,
            out_specs=pl.BlockSpec((1, tr, out_c), lambda n: (n, 0, 0)),
        ),
        compiler_params=_compiler_params(("parallel",)),
    )(*operands)
    return out.reshape(N, H2, W2, out_c)


# ----------------------------------------------------------------------------
# Parameter init (deterministic, synthetic; mirrors PyTorch Conv2d shapes)
# ----------------------------------------------------------------------------
def _init_conv(key, kh, kw, cin, cout):
    kw_key, kb_key = jax.random.split(key)
    fan_in = kh * kw * cin
    scale = 1.0 / np.sqrt(fan_in)
    w = jax.random.uniform(kw_key, (kh, kw, cin, cout), jnp.float32, -scale, scale)
    b = jax.random.uniform(kb_key, (cout,), jnp.float32, -scale, scale)
    return w, b


def init_decoder_params(key, n_class=10):
    layout = {
        "layer0_1x1": (1, 64, 64),
        "layer1_1x1": (1, 64, 64),
        "layer2_1x1": (1, 128, 128),
        "layer3_1x1": (1, 256, 256),
        "layer4_1x1": (1, 512, 512),
        "conv_up3": (3, 256 + 512, 512),
        "conv_up2": (3, 128 + 512, 256),
        "conv_up1": (3, 64 + 256, 256),
        "conv_up0": (3, 64 + 256, 128),
        "conv_final": (3, 64 + 128, 64),
        "conv_last": (1, 64, n_class),
    }
    params = {}
    keys = jax.random.split(key, len(layout))
    for k, (name, (ksz, cin, cout)) in zip(keys, layout.items()):
        params[name] = _init_conv(k, ksz, ksz, cin, cout)
    return params


# ----------------------------------------------------------------------------
# Decoder forward (mirrors the PyTorch forward exactly)
# ----------------------------------------------------------------------------
def decoder_forward(params, x_original, layer0, layer1, layer2, layer3, layer4,
                    *, roll_sign=1):
    # NCHW -> NHWC; the bf16 cast fuses into the XLA transpose pass.
    to_nhwc = lambda a: jnp.transpose(a, (0, 2, 3, 1)).astype(jnp.bfloat16)
    xo, l0, l1, l2, l3, l4 = map(
        to_nhwc, (x_original, layer0, layer1, layer2, layer3, layer4))

    def w1x1(name):
        w, b = params[name]
        return w.reshape(w.shape[2], w.shape[3]), b

    def stage(x, skip, proj_name, conv_name, last_name=None):
        a_up = upsample2x(x)
        w1 = b1 = wl = bl = None
        if proj_name is not None:
            w1, b1 = w1x1(proj_name)
        if last_name is not None:
            wl, bl = w1x1(last_name)
        w3, b3 = params[conv_name]
        return conv3x3_stage(a_up, skip, w1, b1, w3, b3, wl, bl,
                             roll_sign=roll_sign)

    w4, b4 = w1x1("layer4_1x1")
    x = conv1x1(l4, w4, b4)

    x = stage(x, l3, "layer3_1x1", "conv_up3")
    x = stage(x, l2, "layer2_1x1", "conv_up2")
    x = stage(x, l1, "layer1_1x1", "conv_up1")
    x = stage(x, l0, "layer0_1x1", "conv_up0")
    out = stage(x, xo, None, "conv_final", last_name="conv_last")  # f32 NHWC

    return jnp.transpose(out, (0, 3, 1, 2))  # back to NCHW


# ----------------------------------------------------------------------------
# Pure-JAX f32 reference (correctness sanity check in __main__)
# ----------------------------------------------------------------------------
def decoder_reference(params, x_original, layer0, layer1, layer2, layer3, layer4):
    to_nhwc = lambda a: jnp.transpose(a, (0, 2, 3, 1))
    xo, l0, l1, l2, l3, l4 = map(
        to_nhwc, (x_original, layer0, layer1, layer2, layer3, layer4))

    def c1(name, x, relu=True):
        w, b = params[name]
        y = jnp.einsum("nhwc,co->nhwo", x, w.reshape(w.shape[2], w.shape[3])) + b
        return jnp.maximum(y, 0.0) if relu else y

    def c3(name, x):
        w, b = params[name]
        y = jax.lax.conv_general_dilated(
            x, w, (1, 1), "SAME",
            dimension_numbers=("NHWC", "HWIO", "NHWC")) + b
        return jnp.maximum(y, 0.0)

    def up(x):
        _, H, W, _ = x.shape
        MH = jnp.asarray(_bilinear_matrix(H))
        MW = jnp.asarray(_bilinear_matrix(W))
        return jnp.einsum("vh,uw,nhwc->nvuc", MH, MW, x)

    x = up(c1("layer4_1x1", l4))
    x = c3("conv_up3", jnp.concatenate([x, c1("layer3_1x1", l3)], -1))
    x = up(x)
    x = c3("conv_up2", jnp.concatenate([x, c1("layer2_1x1", l2)], -1))
    x = up(x)
    x = c3("conv_up1", jnp.concatenate([x, c1("layer1_1x1", l1)], -1))
    x = up(x)
    x = c3("conv_up0", jnp.concatenate([x, c1("layer0_1x1", l0)], -1))
    x = up(x)
    x = c3("conv_final", jnp.concatenate([x, xo], -1))
    out = c1("conv_last", x, relu=False)
    return jnp.transpose(out, (0, 3, 1, 2))


# ----------------------------------------------------------------------------
if __name__ == "__main__":
    key = jax.random.PRNGKey(0)
    kp, k0, k1, k2, k3, k4, k5 = jax.random.split(key, 7)

    n_class = 10
    params = init_decoder_params(kp, n_class=n_class)

    N = 2
    S = 2  # layer4 spatial size; each stage doubles on the way up
    # Inputs in NCHW (PyTorch convention); small, mutually-consistent shapes.
    x_original = jax.random.normal(k0, (N, 64, 32 * S, 32 * S), jnp.float32)
    layer0 = jax.random.normal(k1, (N, 64, 16 * S, 16 * S), jnp.float32)
    layer1 = jax.random.normal(k2, (N, 64, 8 * S, 8 * S), jnp.float32)
    layer2 = jax.random.normal(k3, (N, 128, 4 * S, 4 * S), jnp.float32)
    layer3 = jax.random.normal(k4, (N, 256, 2 * S, 2 * S), jnp.float32)
    layer4 = jax.random.normal(k5, (N, 512, S, S), jnp.float32)

    sign = probe_roll_sign()
    fwd = jax.jit(functools.partial(decoder_forward, roll_sign=sign))
    out = jax.block_until_ready(
        fwd(params, x_original, layer0, layer1, layer2, layer3, layer4))

    assert out.shape == (N, n_class, 32 * S, 32 * S), out.shape
    assert bool(jnp.all(jnp.isfinite(out)))

    # Sanity check vs. a pure-JAX f32 reference (bf16 operands -> loose tol).
    ref = jax.block_until_ready(jax.jit(decoder_reference)(
        params, x_original, layer0, layer1, layer2, layer3, layer4))
    err = float(jnp.max(jnp.abs(out - ref)))
    scale = float(jnp.max(jnp.abs(ref)))
    assert err <= 0.1 * scale + 0.05, (err, scale)

    print("KERNEL_OK")
</pallas_src>

<mosaic_0001>
module attributes {stable_mosaic.version = 11 : i64} {
  func.func @_roll_probe_kernel(%arg0: memref<8x128xf32, #tpu.memory_space<vmem>>, %arg1: memref<8x128xf32, #tpu.memory_space<vmem>>) attributes {dimension_semantics = [], scalar_prefetch = 0 : i64, scratch_operands = 0 : i64, tpu.core_type = #tpu.core_type<tc>} {
    %c0 = arith.constant 0 : index
    %c0_0 = arith.constant 0 : index
    %0 = vector.load %arg0[%c0, %c0_0] : memref<8x128xf32, #tpu.memory_space<vmem>>, vector<8x128xf32>
    %c1_i32 = arith.constant 1 : i32
    %1 = tpu.dynamic_rotate %0 by %c1_i32 dim 0 : vector<8x128xf32>, i32 -> vector<8x128xf32>
    %c0_1 = arith.constant 0 : index
    %c0_2 = arith.constant 0 : index
    %2 = vector.load %arg1[%c0_1, %c0_2] : memref<8x128xf32, #tpu.memory_space<vmem>>, vector<8x128xf32>
    tpu.vector_store %arg1[%c0_1, %c0_2], %1 {strides = array<i32>} : memref<8x128xf32, #tpu.memory_space<vmem>>, vector<8x128xf32>,
    return
  }
}

</mosaic_0001>

<bundles_post_ra>
// kernel: tpu_custom_call.1
= control target key start
LH: loop header
LB: loop body
LE: loop exit
PB: predicated region body
PF: predicated region fallthrough
CT: control target
= control target key end

     0   :  { %6 = vsyncpa [#allocation3], 0  ;;  %s125_s0 = inlined_call_operand.hbm [shape: f32[8,128], index: 0, kind: input, shape index: {}]   ;;  %s126_s1 = inlined_call_operand.hbm [shape: f32[8,128], index: 1, kind: output, shape index: {}]  }
   0x1   :  { %7 = vsyncpa [#allocation4], 0  ;;  %s89_s6 = smov [#allocation2]   ;;  %s41_s10 = scalar_lea.hbm %s125_s0, 128 }
   0x2   :  { %s14_s7 = sshll.u32 %s89_s6, 4  ;;  %p42_p0 = scmp.ne.s32.totalorder %s125_s0, %s41_s10  ;;  %s15_s7 = int_to_ptr.vmem [resolvable:$true] %s14_s7 }
   0x3   :  { %p45_p1 = scmp.lt.u32.totalorder %s41_s10, %s125_s0 }
   0x5   :  { %p47_p2 = pnand %p45_p1, %p42_p0 }
   0x7   :  { %50 = shalt.err (!%p47_p2)
}
   0x8   :  { %s51_s15 = scalar_lea.vmem %s15_s7, 128  ;;  %p56_p4 = scmp.lt.s32.totalorder %s15_s7, %s15_s7 }
   0x9   :  { %p52_p3 = scmp.ne.s32.totalorder %s15_s7, %s51_s15  ;;  %p57_p5 = scmp.lt.s32.totalorder %s51_s15, %s51_s15 }
   0xb   :  { %p58_p6 = por %p57_p5, %p56_p4 }
   0xd   :  { %p59_p7 = pnand %p58_p6, %p52_p3 }
   0xf   :  { %62 = shalt.err (!%p59_p7)
}
  0x10   :  { %17 = dma.hbm_to_vmem [thread:$0]  %s125_s0, 128, %s15_s7, [#allocation3]  }
  0x11   :  { %85 = dma.done.wait [#allocation3], 128  }
  0x12   :  { %86 = vsyncadd [#allocation3], 4294967168  ;;  %s90_s18 = smov [#allocation5]   ;;  %v21_v0 = vld [vmem:[#allocation2] sm:$0xff] }
  0x13   :  { %s30_s19 = sshll.u32 %s90_s18, 4  ;;  %v22_v1 = vrot.slane %v21_v0, 7  ;;  %s31_s19 = int_to_ptr.vmem [resolvable:$true] %s30_s19 }
  0x14   :  { %s63_s20 = scalar_lea.vmem %s31_s19, 128  ;;  %p68_p9 = scmp.lt.s32.totalorder %s31_s19, %s31_s19 }
  0x15   :  { %23 = vst [vmem:[#allocation5] sm:$0xff] %v22_v1  ;;  %p64_p8 = scmp.ne.s32.totalorder %s31_s19, %s63_s20  ;;  %p69_p10 = scmp.lt.s32.totalorder %s63_s20, %s63_s20 }
  0x17   :  { %p70_p11 = por %p69_p10, %p68_p9 }
  0x19   :  { %p71_p12 = pnand %p70_p11, %p64_p8 }
  0x1b   :  { %74 = shalt.err (!%p71_p12)
}
  0x1c   :  { %s75_s23 = scalar_lea.hbm %s126_s1, 128 }
  0x1d   :  { %p76_p13 = scmp.ne.s32.totalorder %s126_s1, %s75_s23  ;;  %p79_p0 = scmp.lt.u32.totalorder %s75_s23, %s126_s1 }
  0x1f   :  { %p81_p1 = pnand %p79_p0, %p76_p13 }
  0x21   :  { %84 = shalt.err (!%p81_p1)
}
  0x22   :  { %33 = dma.vmem_to_hbm [thread:$0]  %s31_s19, 128, %s126_s1, [#allocation4]  }
  0x23   :  { %87 = dma.done.wait [#allocation4], 128  }
  0x24   :  { %88 = vsyncadd [#allocation4], 4294967168 }
  0x25   :  { %37 = vsyncpa [#allocation3], 1 }
  0x26   :  { %38 = vsyncpa [#allocation4], 1 }

</bundles_post_ra>
